<compile_context>
chip_gen: v5e
topology: v5e:2x2
jax: 0.10.0
libtpu: 0.0.40
codegen_flags: <defaults>
</compile_context>

<pallas_src>
import functools

import jax
import jax.numpy as jnp
from jax.experimental import pallas as pl
from jax.experimental.pallas import tpu as pltpu


def _round_up(v, m):
    return -(-v // m) * m


def _vmem_budget_bytes():
    """Generation-aware usable VMEM budget (leaves headroom for compiler scratch)."""
    try:
        cap = int(pltpu.get_tpu_info().vmem_capacity_bytes)
    except Exception:
        cap = 64 << 20  # conservative default (v7x physical VMEM)
    # v7x (64 MiB)   -> ~51 MiB usable
    # v5e/v6e (128M) -> ~102 MiB usable (well above the 16/32 MiB scoped defaults)
    budget = min(int(cap * 0.8), cap - (8 << 20))
    return max(budget, 32 << 20)  # explicit floor (v5e scoped default is 16 MiB)


# ----------------------------- kernels ---------------------------------------


def _wide_kernel_fullk(x_ref, w_ref, b_ref, o_ref):
    # x_ref: (TB, K) native dtype  w_ref: (P, K)  b_ref: (P, 1)  o_ref: (P, TB) f32
    x = x_ref[...].astype(jnp.float32)  # in-kernel cast keeps HBM reads narrow
    w = w_ref[...].astype(jnp.float32)
    o_ref[...] = jax.lax.dot_general(
        w, x,
        dimension_numbers=(((1,), (1,)), ((), ())),
        preferred_element_type=jnp.float32,
    ) + b_ref[...]


def _wide_kernel_ktiled(x_ref, w_ref, b_ref, o_ref, acc_ref, *,
                        tk, wide_dim, ragged, resident_w):
    # x_ref: (TB, TK) native dtype
    # w_ref: (grid_k, P, TK) resident  OR  (P, TK) pipelined
    # b_ref: (P, 1)   o_ref: (P, TB) f32   acc_ref: (P, TB) f32 scratch
    k = pl.program_id(1)

    @pl.when(k == 0)
    def _():
        acc_ref[...] = jnp.zeros_like(acc_ref)

    x = x_ref[...].astype(jnp.float32)
    if ragged:
        # Zero the invalid K tail of the last block (Pallas partial-block data is
        # undefined and would otherwise flow into the reduction).
        col = jax.lax.broadcasted_iota(jnp.int32, x.shape, 1)
        x = jnp.where(col < (wide_dim - k * tk), x, 0.0)

    if resident_w:
        w = w_ref[k].astype(jnp.float32)          # (P, TK) slice, no per-step DMA
    else:
        w = w_ref[...].astype(jnp.float32)        # lane-dense pipelined tile

    acc_ref[...] += jax.lax.dot_general(
        w, x,
        dimension_numbers=(((1,), (1,)), ((), ())),
        preferred_element_type=jnp.float32,
    )

    @pl.when(k == pl.num_programs(1) - 1)
    def _():
        o_ref[...] = acc_ref[...] + b_ref[...]


# ----------------------------- wrapper ----------------------------------------


@functools.partial(
    jax.jit, static_argnames=("block_batch", "block_k", "weight_resident"))
def wide_forward(x, weight, bias, *, block_batch=2048, block_k=None,
                 weight_resident=None):
    """Wide (linear) forward pass: (batch, wide_dim) -> (batch, pred_dim) float32.

    Args:
      x:       (batch, wide_dim), any real dtype; cast to f32 inside the kernel
               (matches X.float() in the PyTorch module).
      weight:  (pred_dim, wide_dim) — PyTorch nn.Linear native layout.
      bias:    (pred_dim,)
      block_batch: requested batch tile (lane axis of the transposed output).
      block_k: requested K tile; None = auto (prefer full-K, shrink to fit VMEM).
      weight_resident: None = auto, True/False to force the weight residency mode
               when K is tiled.
    """
    batch, wide_dim = x.shape
    pred_dim, wd2 = weight.shape
    assert wd2 == wide_dim, "weight must be (pred_dim, wide_dim)"

    if x.dtype == jnp.bool_:
        x = x.astype(jnp.int8)          # i1 blocks are awkward; int8 is cheap
    x_item = x.dtype.itemsize
    pred_pad = _round_up(pred_dim, 8)

    budget = _vmem_budget_bytes()
    usable = int(budget * 0.9)          # our own headroom inside the budget

    # ---- batch tile (lane axis of the transposed output) --------------------
    block_batch = max(128, int(block_batch))
    if batch >= 256:
        # keep >= 2 batch tiles so the "parallel" axis feeds both v7x TensorCores
        tb = min(_round_up(min(block_batch, batch), 128),
                 _round_up(pl.cdiv(batch, 2), 128))
    else:
        tb = batch                      # single full tile; any batch size is legal

    # ---- padded-layout VMEM accounting ---------------------------------------
    def _vmem_needed(tb_, tk_, grid_k_, resident_):
        tb_sub = _round_up(tb_, 8)                      # X sublane pad
        tk_lane = _round_up(tk_, 128)                   # X lane pad
        tb_lane = _round_up(tb_, 128)                   # out / acc lane pad
        n = 2 * tb_sub * tk_lane * x_item               # double-buffered X tile
        w_lanes = grid_k_ * tk_lane if resident_ else tk_lane
        n += 2 * pred_pad * w_lanes * 4                 # weight (count 2 bufs)
        n += 2 * pred_pad * 128 * 4                     # bias
        n += 2 * pred_pad * tb_lane * 4                 # output tile
        n += pred_pad * tb_lane * 4 if grid_k_ > 1 else 0   # f32 accumulator
        return n

    # ---- K tile ---------------------------------------------------------------
    if block_k is None or _round_up(block_k, 128) >= wide_dim:
        tk = wide_dim                    # prefer a single, un-tiled contraction
    else:
        tk = max(128, _round_up(block_k, 128))

    resident_w = True
    for _ in range(64):                  # shrink until the tiles fit the budget
        grid_k = pl.cdiv(wide_dim, tk)
        if weight_resident is None:
            resident_w = (grid_k == 1) or (
                2 * pred_pad * _round_up(grid_k * tk, 128) * 4 <= usable * 0.35)
        else:
            resident_w = bool(weight_resident) or (grid_k == 1)
        if _vmem_needed(tb, tk, grid_k, resident_w) <= usable:
            break
        if tk > 128:
            tk = max(128, ((tk // 2) // 128) * 128)
        elif tb > 128:
            tb = max(128, ((tb // 2) // 128) * 128)
        else:
            break                        # minimal tiles; let the compiler cope

    grid_k = pl.cdiv(wide_dim, tk)
    grid_b = pl.cdiv(batch, tb)
    ragged_k = (grid_k > 1) and (wide_dim % tk != 0)
    k_pad = grid_k * tk

    bias2d = bias.reshape(pred_dim, 1).astype(jnp.float32)

    cost = pl.CostEstimate(
        flops=2 * batch * wide_dim * pred_dim,
        transcendentals=0,
        bytes_accessed=(batch * wide_dim * x_item
                        + wide_dim * pred_dim * weight.dtype.itemsize
                        + batch * pred_dim * 4
                        + pred_dim * 4),
    )

    if grid_k == 1:
        # Specialized path: no accumulator scratch, no zero-init, bias fused.
        weight_in = weight
        grid = (grid_b,)
        in_specs = [
            pl.BlockSpec((tb, wide_dim), lambda i: (i, 0)),           # X tile
            pl.BlockSpec((pred_dim, wide_dim), lambda i: (0, 0)),     # resident W
            pl.BlockSpec((pred_dim, 1), lambda i: (0, 0)),            # bias
        ]
        out_spec = pl.BlockSpec((pred_dim, tb), lambda i: (0, i))
        scratch = []
        kernel = _wide_kernel_fullk
        dims = ("parallel",)
    else:
        # K-tiled path (reduction axis last in the grid).
        if ragged_k:
            # zero-pad the (tiny) weight once so the K tail contributes exact zeros
            w_padded = jnp.pad(weight, ((0, 0), (0, k_pad - wide_dim)))
        else:
            w_padded = weight
        if resident_w:
            # whole weight resident in VMEM, lane-dense, indexed with w_ref[k]
            weight_in = w_padded.reshape(pred_dim, grid_k, tk).transpose(1, 0, 2)
            w_spec = pl.BlockSpec((grid_k, pred_dim, tk), lambda i, k: (0, 0, 0))
        else:
            weight_in = w_padded
            w_spec = pl.BlockSpec((pred_dim, tk), lambda i, k: (0, k))
        grid = (grid_b, grid_k)
        in_specs = [
            pl.BlockSpec((tb, tk), lambda i, k: (i, k)),              # X tile
            w_spec,                                                   # weight
            pl.BlockSpec((pred_dim, 1), lambda i, k: (0, 0)),         # bias
        ]
        out_spec = pl.BlockSpec((pred_dim, tb), lambda i, k: (0, i))
        scratch = [pltpu.VMEM((pred_dim, tb), jnp.float32)]
        kernel = functools.partial(_wide_kernel_ktiled, tk=tk, wide_dim=wide_dim,
                                   ragged=ragged_k, resident_w=resident_w)
        dims = ("parallel", "arbitrary")

    out_t = pl.pallas_call(
        kernel,
        out_shape=jax.ShapeDtypeStruct((pred_dim, batch), jnp.float32),
        grid_spec=pltpu.PrefetchScalarGridSpec(
            num_scalar_prefetch=0,
            grid=grid,
            in_specs=in_specs,
            out_specs=out_spec,
            scratch_shapes=scratch,
        ),
        compiler_params=pltpu.CompilerParams(
            dimension_semantics=dims,
            vmem_limit_bytes=int(budget),
        ),
        cost_estimate=cost,
    )(x, weight_in, bias2d)

    # (pred_dim, batch) -> (batch, pred_dim): matches nn.Linear output layout.
    return out_t.T


def init_wide_params(key, wide_dim, pred_dim=1):
    """nn.Linear default init: uniform(-1/sqrt(fan_in), 1/sqrt(fan_in))."""
    kw, kb = jax.random.split(key)
    bound = 1.0 / jnp.sqrt(jnp.float32(wide_dim))
    weight = jax.random.uniform(
        kw, (pred_dim, wide_dim), jnp.float32, minval=-bound, maxval=bound)
    bias = jax.random.uniform(
        kb, (pred_dim,), jnp.float32, minval=-bound, maxval=bound)
    return weight, bias


if __name__ == "__main__":
    key = jax.random.PRNGKey(0)
    k1, k2, k3, kp1, kp2, kp3 = jax.random.split(key, 6)

    # Case 1: ragged batch + ragged K tiling + resident weight + accumulator.
    batch1, wd1, pd1 = 300, 640, 1
    w1, b1 = init_wide_params(kp1, wd1, pd1)
    x1 = jax.random.bernoulli(k1, p=0.5, shape=(batch1, wd1)).astype(jnp.int8)
    out1 = jax.block_until_ready(wide_forward(x1, w1, b1, block_k=256))
    ref1 = x1.astype(jnp.float32) @ w1.T + b1[None, :]
    assert out1.shape == (batch1, pd1)
    assert jnp.allclose(out1, ref1, atol=5e-3, rtol=5e-3)

    # Case 2: small batch, single full-K tile (specialized grid_k == 1 kernel).
    batch2, wd2, pd2 = 64, 512, 1
    w2, b2 = init_wide_params(kp2, wd2, pd2)
    x2 = jax.random.normal(k2, (batch2, wd2), jnp.float32)
    out2 = jax.block_until_ready(wide_forward(x2, w2, b2))
    ref2 = x2 @ w2.T + b2[None, :]
    assert out2.shape == (batch2, pd2)
    assert jnp.allclose(out2, ref2, atol=5e-3, rtol=5e-3)

    # Case 3: pred_dim > 1, exact K tiling, pipelined (non-resident) weight path.
    batch3, wd3, pd3 = 256, 384, 3
    w3, b3 = init_wide_params(kp3, wd3, pd3)
    x3 = jax.random.bernoulli(k3, p=0.5, shape=(batch3, wd3)).astype(jnp.int8)
    out3 = jax.block_until_ready(
        wide_forward(x3, w3, b3, block_k=128, weight_resident=False))
    ref3 = x3.astype(jnp.float32) @ w3.T + b3[None, :]
    assert out3.shape == (batch3, pd3)
    assert jnp.allclose(out3, ref3, atol=5e-3, rtol=5e-3)

    print("KERNEL_OK")
</pallas_src>

<mosaic_0001>
module attributes {stable_mosaic.version = 11 : i64} {
  func.func @_wide_kernel_ktiled(%arg0: i32, %arg1: i32, %arg2: memref<256x256xi8, #tpu.memory_space<vmem>>, %arg3: memref<3x1x256xf32, #tpu.memory_space<vmem>>, %arg4: memref<1x1xf32, #tpu.memory_space<vmem>>, %arg5: memref<1x256xf32, #tpu.memory_space<vmem>>, %arg6: memref<1x256xf32, #tpu.memory_space<vmem>>) attributes {dimension_semantics = [#tpu.dimension_semantics<parallel>, #tpu.dimension_semantics<arbitrary>], iteration_bounds = array<i64: 2, 3>, scalar_prefetch = 0 : i64, scratch_operands = 1 : i64, tpu.core_type = #tpu.core_type<tc>, window_params = [{transform_indices = @transform_0, window_bounds = array<i64: 256, 256>}, {pipeline_mode = #tpu.pipeline_mode<synchronous>, transform_indices = @transform_1, window_bounds = array<i64: 3, 1, 256>}, {pipeline_mode = #tpu.pipeline_mode<synchronous>, transform_indices = @transform_2, window_bounds = array<i64: 1, 1>}, {transform_indices = @transform_3, window_bounds = array<i64: 1, 256>}]} {
    %c0_i32 = arith.constant 0 : i32
    %0 = arith.cmpi eq, %arg1, %c0_i32 : i32
    %1 = arith.extui %0 : i1 to i32
    %c0_i32_0 = arith.constant 0 : i32
    %2 = arith.cmpi ne, %1, %c0_i32_0 : i32
    scf.if %2 {
      %cst_10 = arith.constant 0.000000e+00 : f32
      %22 = vector.broadcast %cst_10 : f32 to vector<1x256xf32>
      %c0_11 = arith.constant 0 : index
      %c0_12 = arith.constant 0 : index
      %23 = vector.load %arg6[%c0_11, %c0_12] : memref<1x256xf32, #tpu.memory_space<vmem>>, vector<1x256xf32>
      tpu.vector_store %arg6[%c0_11, %c0_12], %22 {strides = array<i32>} : memref<1x256xf32, #tpu.memory_space<vmem>>, vector<1x256xf32>,
    } else {
    }
    %c0 = arith.constant 0 : index
    %c0_1 = arith.constant 0 : index
    %3 = vector.load %arg2[%c0, %c0_1] : memref<256x256xi8, #tpu.memory_space<vmem>>, vector<256x256xi8>
    %4 = arith.sitofp %3 : vector<256x256xi8> to vector<256x256xf32>
    %5 = tpu.iota {dimensions = array<i32: 1>} : vector<256x256xi32>
    %c256_i32 = arith.constant 256 : i32
    %6 = arith.muli %arg1, %c256_i32 : i32
    %c640_i32 = arith.constant 640 : i32
    %7 = arith.subi %c640_i32, %6 : i32
    %8 = vector.broadcast %7 : i32 to vector<256x256xi32>
    %9 = arith.cmpi slt, %5, %8 : vector<256x256xi32>
    %cst = arith.constant 0.000000e+00 : f32
    %10 = vector.broadcast %cst : f32 to vector<256x256xf32>
    %11 = arith.select %9, %4, %10 : vector<256x256xi1>, vector<256x256xf32>
    %12 = arith.index_cast %arg1 : i32 to index
    %c0_2 = arith.constant 0 : index
    %c0_3 = arith.constant 0 : index
    %13 = vector.load %arg3[%12, %c0_2, %c0_3] : memref<3x1x256xf32, #tpu.memory_space<vmem>>, vector<1x1x256xf32>
    %14 = vector.shape_cast %13 : vector<1x1x256xf32> to vector<1x256xf32>
    %c0_4 = arith.constant 0 : index
    %c0_5 = arith.constant 0 : index
    %15 = vector.load %arg6[%c0_4, %c0_5] : memref<1x256xf32, #tpu.memory_space<vmem>>, vector<1x256xf32>
    %cst_6 = arith.constant dense<0.000000e+00> : vector<1x256xf32>
    %16 = tpu.matmul %14, %11, %cst_6 {dimension_numbers = #tpu.dot_dimension_numbers<[1], [1], [0], [0], [0, 0, 1, 0], [], []>} : vector<1x256xf32>, vector<256x256xf32>, vector<1x256xf32> -> vector<1x256xf32>
    %17 = arith.addf %15, %16 : vector<1x256xf32>
    %c0_7 = arith.constant 0 : index
    %c0_8 = arith.constant 0 : index
    %18 = vector.load %arg6[%c0_7, %c0_8] : memref<1x256xf32, #tpu.memory_space<vmem>>, vector<1x256xf32>
    tpu.vector_store %arg6[%c0_7, %c0_8], %17 {strides = array<i32>} : memref<1x256xf32, #tpu.memory_space<vmem>>, vector<1x256xf32>,
    %c2_i32 = arith.constant 2 : i32
    %19 = arith.cmpi eq, %arg1, %c2_i32 : i32
    %20 = arith.extui %19 : i1 to i32
    %c0_i32_9 = arith.constant 0 : i32
    %21 = arith.cmpi ne, %20, %c0_i32_9 : i32
    scf.if %21 {
      %c0_10 = arith.constant 0 : index
      %c0_11 = arith.constant 0 : index
      %22 = vector.load %arg6[%c0_10, %c0_11] : memref<1x256xf32, #tpu.memory_space<vmem>>, vector<1x256xf32>
      %c0_12 = arith.constant 0 : index
      %c0_13 = arith.constant 0 : index
      %23 = vector.load %arg4[%c0_12, %c0_13] : memref<1x1xf32, #tpu.memory_space<vmem>>, vector<1x1xf32>
      %24 = vector.broadcast %23 : vector<1x1xf32> to vector<1x256xf32>
      %25 = arith.addf %22, %24 : vector<1x256xf32>
      %c0_14 = arith.constant 0 : index
      %c0_15 = arith.constant 0 : index
      %26 = vector.load %arg5[%c0_14, %c0_15] : memref<1x256xf32, #tpu.memory_space<vmem>>, vector<1x256xf32>
      tpu.vector_store %arg5[%c0_14, %c0_15], %25 {strides = array<i32>} : memref<1x256xf32, #tpu.memory_space<vmem>>, vector<1x256xf32>,
    } else {
    }
    return
  }
  func.func @transform_0(%arg0: i32, %arg1: i32) -> (i32, i32) {
    %c0_i32 = arith.constant 0 : i32
    return %arg0, %arg1 : i32, i32
  }
  func.func @transform_1(%arg0: i32, %arg1: i32) -> (i32, i32, i32) {
    %c0_i32 = arith.constant 0 : i32
    %c0_i32_0 = arith.constant 0 : i32
    %c0_i32_1 = arith.constant 0 : i32
    %c0_i32_2 = arith.constant 0 : i32
    return %c0_i32, %c0_i32_0, %c0_i32_1 : i32, i32, i32
  }
  func.func @transform_2(%arg0: i32, %arg1: i32) -> (i32, i32) {
    %c0_i32 = arith.constant 0 : i32
    %c0_i32_0 = arith.constant 0 : i32
    %c0_i32_1 = arith.constant 0 : i32
    return %c0_i32, %c0_i32_0 : i32, i32
  }
  func.func @transform_3(%arg0: i32, %arg1: i32) -> (i32, i32) {
    %c0_i32 = arith.constant 0 : i32
    %c0_i32_0 = arith.constant 0 : i32
    return %c0_i32, %arg0 : i32, i32
  }
}

</mosaic_0001>

<bundles_post_ra>
// kernel: wide_forward.1
= control target key start
LH: loop header
LB: loop body
LE: loop exit
PB: predicated region body
PF: predicated region fallthrough
CT: control target
= control target key end

     0   :  { %s1610_s0 = inlined_call_operand.hbm [shape: s8[300,640], index: 0, kind: input, shape index: {}]   ;;  %s1611_s1 = inlined_call_operand.vmem [shape: f32[3,1,256], index: 1, kind: input, shape index: {}]   ;;  %s1612_s2 = inlined_call_operand.<no memory space> [shape: f32[1,1], index: 2, kind: input, shape index: {}]   ;;  %s1613_s3 = inlined_call_operand.hbm [shape: f32[1,300], index: 3, kind: output, shape index: {}]  }
   0x1   :  { %v8_v0 = vstv %s1612_s2 }
   0x2   :  { %9 = vst [vmem:[#allocation3] sm:$0x1] %v8_v0 }
   0x3   :  { %10 = vsyncpa [#allocation5], 0 }
   0x4   :  { %12 = vsyncpa [#allocation5 + $0x1], 0 }
   0x5   :  { %13 = vsyncpa [#allocation6], 0 }
   0x6   :  { %15 = vsyncpa [#allocation6 + $0x1], 0  ;;  %s1202_s14 = smov 0   ;;  %s1204_s15 = smov 0  }
   0x7   :  { %s1206_s16 = smov 0   ;;  %s1208_s17 = smov 0  }
   0x8   :  { %s1210_s18 = smov 0   ;;  %s1212_s19 = smov 0  }
   0x9   :  { %s1214_s20 = smov 0   ;;  %s1216_s2 = smov 0  }
   0xa   :  { %s1218_s21 = smov 0   ;;  %s1220_s22 = smov 0  }
   0xb   :  { %s1222_s23 = smov 0  }
   0xc LB: > { %1619 = sst [smem:[#allocation10_spill]] %s1151_s19  ;;  %s699_s24 = sadd.s32 4294967295, %s1171_s23   ;;  %s1171_s23 = sphi %s1222_s23, %s21_s23   ;;  %s1167_s22 = sphi %s1220_s22, %s1646_s22   ;;  %s1163_s21 = sphi %s1218_s21, %s1638_s21   ;;  %s1159_s2 = sphi %s1216_s2, %s1645_s2   ;;  %s1155_s20 = sphi %s1214_s20, %s1637_s20   ;;  %s1151_s19 = sphi %s1212_s19, %s1636_s19   ;;  %s1147_s18 = sphi %s1210_s18, %s1644_s18   ;;  %s1143_s17 = sphi %s1208_s17, %s1643_s17   ;;  %s1139_s16 = sphi %s1206_s16, %s1642_s16   ;;  %s1135_s15 = sphi %s1204_s15, %s1641_s15   ;;  %s1131_s14 = sphi %s1202_s14, %s1640_s14  }
   0xd   : > { %1620 = sst [smem:[#allocation11_spill]] %s1163_s21  ;;  %s700_s25 = sadd.s32 4294967294, %s1171_s23  }
   0xe   : > { %s30_s26 = sadd.s32 1, %s1163_s21  ;;  %s33_s27 = sadd.s32 1, %s1167_s22 }
   0xf   : > { %p31_p0 = scmp.ge.s32.totalorder %s30_s26, 3  ;;  %s42_s28 = sadd.s32 1, %s1151_s19 }
  0x10   : > { %p49_p1 = scmp.ne.s32.totalorder %s1151_s19, %s1147_s18  ;;  %p50_p2 = scmp.eq.s32.totalorder %s1171_s23, 0 }
  0x11   : > { %s1648_s26 = smov (%p31_p0, %s30_s26), 0  ;;  %s1650_s27 = smov (!%p31_p0, %s33_s27), %s1167_s22 }
  0x12   : > { %1621 = sst [smem:[#allocation12_spill]] %s1648_s26  ;;  %s38_s29 = ssub.s32 %s1163_s21, %s1648_s26 }
  0x13   : > { %p1268_p3 = por %p50_p2, %p49_p1  ;;  %p35_p4 = scmp.ge.s32.totalorder %s1650_s27, 2 }
  0x14   : > { %p55_p5 = scmp.ne.s32.totalorder %s1147_s18, %s1143_s17  ;;  %p56_p6 = scmp.eq.s32.totalorder %s699_s24, 0 }
  0x15   : > { %s110_s4 = sadd.s32 1, %s1139_s16  ;;  %s1652_s27 = smov (%p35_p4, %s1650_s27), 0 }
  0x16   : > { %1623 = sst [smem:[#allocation13_spill]] %s1652_s27  ;;  %p1276_p7 = por %p56_p6, %p55_p5 }
  0x17   : > { %p120_p8 = scmp.ne.s32.totalorder %s1139_s16, %s1135_s15  ;;  %s37_s6 = ssub.s32 %s1167_s22, %s1652_s27 }
  0x18   : > { %p121_p9 = scmp.eq.s32.totalorder %s699_s24, 5  ;;  %s39_s7 = sor.u32 %s38_s29, %s37_s6 }
  0x19   : > { %p108_p10 = scmp.eq.s32.totalorder %s37_s6, 0  ;;  %p40_p11 = scmp.eq.s32.totalorder %s39_s7, 0 }
  0x1a   : > { %p1284_p12 = por %p121_p9, %p120_p8  ;;  %p126_p13 = scmp.ne.s32.totalorder %s1135_s15, %s1131_s14 }
  0x1b   : > { %s1289_s9 = scalar_select %p108_p10, %s1139_s16, %s110_s4  }
  0x1c   : > { %s1292_s10 = scalar_select %p40_p11, %s1151_s19, %s42_s28  }
  0x1d   : > { %1626 = sst [smem:[#allocation14_spill]] %s1289_s9  ;;  %p127_p0 = scmp.eq.s32.totalorder %s700_s25, 5 }
  0x1e   : > { %1627 = sst [smem:[#allocation15_spill]] %s1292_s10  ;;  %p702_p2 = scmp.ge.s32.totalorder %s1171_s23, 6 }
  0x1f   : > { %p1296_p1 = por %p127_p0, %p126_p13 }
  0x20   : > { %149 = sbr.rel (%p702_p2) target bundleno = 79 (0x4f), region = 24 }
  0x25   : > { %152 = sbr.rel (!%p1268_p3) target bundleno = 79 (0x4f), region = 28  ;;  %s153_s12 = sand.u32 (%p1268_p3), 1, %s1151_s19  }
  0x26   : > { %s704_s13 = sshll.u32 (%p1268_p3), %s1167_s22, 5  ;;  %s703_s17 = sshll.u32 (%p1268_p3), %s153_s12, 7 }
  0x27   : > { %s705_s24 = sshll.u32 (%p1268_p3), %s1163_s21, 1  ;;  %s160_s28 = ssub.s32 (%p1268_p3), 38, %s704_s13 }
  0x28   : > { %s164_s29 = ssub.s32 (%p1268_p3), 5, %s705_s24  ;;  %p161_p4 = scmp.lt.s32.totalorder (%p1268_p3), %s160_s28, 32 }
  0x29   : > { %p165_p5 = scmp.lt.s32.totalorder (%p1268_p3), %s164_s29, 2  ;;  %s1312_s7 = scalar_lea.sflag (%p1268_p3), [#allocation5], %s153_s12 }
  0x2a   : > { %s1654_s28 = smov (!%p161_p4, %s160_s28), 32  ;;  %s157_s27 = scalar_lea.vmem [#allocation4], %s703_s17 }
  0x2b   : > { %s1656_s29 = smov (!%p165_p5, %s164_s29), 2  ;;  %s706_s25 = sshll.u32 %s1654_s28, 1 }
  0x2c   : > { %s1309_s4 = smul.u32 %s706_s25, %s1656_s29 }
  0x2e   : > { %s168_s30 = ssub.s32 128, %s1309_s4 }
  0x2f   : > { %s169_s6 = sshll.u32 %s168_s30, 4 }
  0x30   : > { %170 = vsyncadd %s1312_s7, %s169_s6  ;;  %p707_p3 = scmp.ne.s32.totalorder %s1309_s4, 0  ;;  %s898_s13 = smul.u32 160, %s1167_s22 }
  0x31   : > { %s1618_s26 = sshll.u32 %s1656_s29, 1  ;;  %s1318_s21 = sshll.u32 %s157_s27, 4  ;;  %s181_s21 = int_to_ptr.vmem [resolvable:$true] %s1318_s21 }
  0x32   : > { %s173_s25 = sadd.s32 %s898_s13, %s705_s24  ;;  %s1322_s10 = smul.u32 %s1618_s26, %s1654_s28 }
  0x33   : > { %s709_s12 = sshll.u32 %s173_s25, 1  ;;  %s1010_s26 = scalar_lea.hbm %s1610_s0, 380 }
  0x34   : > { %s175_s6 = scalar_lea.hbm %s1610_s0, %s709_s12  ;;  %s182_s19 = sshll.u32 %s1322_s10, 4 }
  0x35   : > { %s178_s9 = sshll.u32 %s175_s6, 4  ;;  %s1001_s24 = sshrl.u32 %s182_s19, 4  ;;  %s1329_s9 = int_to_ptr.hbm [resolvable:$true] %s178_s9 }
  0x36   : > { %s999_s27 = sshra.s32 %s1329_s9, 4  ;;  %s1000_s27 = int_to_ptr.hbm [resolvable:$true] %s999_s27 }
  0x37   : > { %s1006_s13 = scalar_lea.hbm %s1000_s27, %s1001_s24 }
  0x38   : > { %p1007_p6 = scmp.ne.s32.totalorder %s1000_s27, %s1006_s13  ;;  %p1012_p10 = scmp.lt.s32.totalorder %s1010_s26, %s1006_s13 }
  0x3a   : > { %p1008_p8 = pnand %p1007_p6, %p707_p3 }
  0x3c   : > { %p1009_p9 = pneg %p1008_p8 }
  0x3e   : > { %p1014_p11 = pnand %p1012_p10, %p1009_p9 }
  0x40   : > { %1017 = shalt.err (!%p1014_p11)
}
  0x41   : > { %s1018_s12 = sshra.s32 %s181_s21, 4  ;;  %s1173_s30 = smov [#allocation4]   ;;  %s1019_s12 = int_to_ptr.vmem [resolvable:$true] %s1018_s12 }
  0x42   : > { %s1025_s17 = scalar_lea.vmem %s1019_s12, %s1001_s24  ;;  %s1029_s6 = scalar_lea.vmem %s1173_s30, 256 }
  0x43   : > { %p1026_p13 = scmp.ne.s32.totalorder %s1019_s12, %s1025_s17  ;;  %p1031_p4 = scmp.lt.s32.totalorder %s1029_s6, %s1025_s17 }
  0x45   : > { %p1027_p0 = pnand %p1026_p13, %p707_p3 }
  0x47   : > { %p1028_p2 = pneg %p1027_p0 }
  0x49   : > { %p1033_p5 = pnand %p1031_p4, %p1028_p2 }
  0x4b   : > { %1036 = shalt.err (!%p1033_p5)
}
  0x4c   : > { %s1174_s27 = smov 160   ;;  %s1175_s26 = smov 64  }
  0x4d   : > { %s1629_s13 = sshll.u32 %s1656_s29, 1 }
  0x4e   : > { %186 = dma.hbm_to_vmem [thread:$0]  (%p707_p3), %s1329_s9, %s182_s19, %s181_s21, %s1312_s7, %s1174_s27, %s1175_s26, %s1629_s13  }
  0x4f PF: > { %p711_p6 = scmp.ge.s32.totalorder %s1171_s23, 1  ;;  %p188_p8 = scmp.lt.s32.totalorder %s1171_s23, 7 }
  0x51   : > { %p189_p9 = pnand %p711_p6, %p188_p8 }
  0x52   : > { %s194_s24 = sand.u32 (!%p189_p9), 1, %s1147_s18  }
  0x53   : > { %192 = sbr.rel (%p189_p9) target bundleno = 466 (0x1d2), region = 32  ;;  %s712_s28 = sshll.u32 (!%p189_p9), %s194_s24, 7 }
  0x54   : > { %s195_s25 = scalar_lea.sflag (!%p189_p9), [#allocation5], %s194_s24  ;;  %s1356_s12 = scalar_lea.vmem (!%p189_p9), [#allocation4], %s712_s28 }
  0x58   : > { %1122 = dma.done.wait (%p1276_p7), %s195_s25, 2048  }
  0x59   : > { %1124 = vsyncadd (%p1276_p7), %s195_s25, 4294965248  ;;  %s219_s19 = sand.u32 1, %s1135_s15   ;;  %p714_p3 = scmp.ne.s32.totalorder %s1155_s20, 0 }
  0x5a   : > { %s1365_s21 = sshll.u32 %s219_s19, 1 }
  0x5b   : > { %s221_s9 = scalar_lea.vmem [#allocation7], %s1365_s21  ;;  %239 = sbr.rel (%p714_p3) target bundleno = 100 (0x64), region = 40 }
  0x60   : > { %v240_v1 = vlaneseq  ;;  %v1176_v2 = vmov 0.0  }
  0x62   : > { %vm242_vm0 = vcmp.lt.s32.totalorder %v240_v1, 256 }
  0x63   : > { %244 = vst.msk [vmem:[#allocation2] sm:$0x3] %vm242_vm0, %v1176_v2 }
  0x64 PF: > { %v897_v3 = vld [vmem:[%s1356_s12 + $0x78] sm:$0xff]   ;;  %v405_v4 = vlaneseq  ;;  %s715_s5 = sshll.u32 %s1155_s20, 8  ;;  %v896_v13 = vld [vmem:[%s1356_s12 + $0x70] sm:$0xff]   ;;  %v895_v36 = vld [vmem:[%s1356_s12 + $0x68] sm:$0xff]   ;;  %s716_s29 = sshll.u32 %s1155_s20, 1  ;;  %vm569_vm3 = vcmask 1040384  }
  0x65   : > { %v889_v5 = vld [vmem:[%s1356_s12 + $0x38] sm:$0xff]   ;;  %v881_v6 = vunpack.c.2.s8 %v897_v3  ;;  %s409_s10 = ssub.s32 640, %s715_s5  ;;  %v882_v7 = vunpack.c.3.s8 %v897_v3  ;;  %v879_v8 = vunpack.c.0.s8 %v897_v3  ;;  %v880_v16 = vunpack.c.1.s8 %v897_v3  ;;  %v888_v17 = vld [vmem:[%s1356_s12 + $0x30] sm:$0xff]   ;;  %v887_v42 = vld [vmem:[%s1356_s12 + $0x28] sm:$0xff]   ;;  %s478_s17 = scalar_lea.vmem %s1611_s1, %s716_s29 }
  0x66   : > { %v406_v9 = vand.u32 127, %v405_v4  ;;  %v410_v10 = vstv %s409_s10  ;;  %v833_v11 = vunpack.c.2.s8 %v889_v5  ;;  %v834_v12 = vunpack.c.3.s8 %v889_v5  ;;  %v894_v54 = vld [vmem:[%s1356_s12 + $0x60] sm:$0xff]   ;;  %p781_p7 = scmp.ne.s32.totalorder %s1155_s20, 2 }
  0x67   : > { %v403_v14 = vcvt.s32.f32 %v881_v6  ;;  %v404_v15 = vcvt.s32.f32 %v882_v7  ;;  %v401_v22 = vcvt.s32.f32 %v879_v8  ;;  %v875_v23 = vunpack.c.2.s8 %v896_v13  ;;  %v886_v60 = vld [vmem:[%s1356_s12 + $0x20] sm:$0xff]  }
  0x68   : > { %vm1375_vm1 = vcmp.lt.s32.totalorder %v406_v9, %v410_v10  ;;  %v407_v19 = vadd.s32 128, %v406_v9  ;;  %v371_v20 = vcvt.s32.f32 %v833_v11  ;;  %v372_v21 = vcvt.s32.f32 %v834_v12  ;;  %v893_v9 = vld [vmem:[%s1356_s12 + $0x58] sm:$0xff]  }
  0x69   : > { %749 = vmatpush.xpose.msk.msra.mxu2 %vm1375_vm1, %v403_v14  ;;  %v831_v24 = vunpack.c.0.s8 %v889_v5  ;;  %v832_v25 = vunpack.c.1.s8 %v889_v5  ;;  %v827_v27 = vunpack.c.2.s8 %v888_v17  ;;  %v402_v28 = vcvt.s32.f32 %v880_v16 }
  0x6a   : > { %vm1381_vm2 = vcmp.lt.s32.totalorder %v407_v19, %v410_v10  ;;  %717 = vmatpush.xpose.msk.msra.mxu0 %vm1375_vm1, %v371_v20  ;;  %v876_v29 = vunpack.c.3.s8 %v896_v13  ;;  %v828_v32 = vunpack.c.3.s8 %v888_v17  ;;  %v399_v33 = vcvt.s32.f32 %v875_v23  ;;  %v480_v18 = vld [vmem:[#allocation2] sm:$0x3] }
  0x6b   : > { %765 = vmatpush.xpose.msk.msra.mxu3 %vm1381_vm2, %v404_v15  ;;  %733 = vmatpush.xpose.msk.msra.mxu1 %vm1381_vm2, %v372_v21  ;;  %v369_v30 = vcvt.s32.f32 %v831_v24  ;;  %v370_v31 = vcvt.s32.f32 %v832_v25  ;;  %v873_v34 = vunpack.c.0.s8 %v896_v13  ;;  %v367_v35 = vcvt.s32.f32 %v827_v27  ;;  %v885_v15 = vld [vmem:[%s1356_s12 + $0x18] sm:$0xff]  }
  0x6c   : > { %v825_v37 = vunpack.c.0.s8 %v888_v17  ;;  %v400_v38 = vcvt.s32.f32 %v876_v29  ;;  %v874_v39 = vunpack.c.1.s8 %v896_v13  ;;  %v368_v40 = vcvt.s32.f32 %v828_v32  ;;  %v892_v29 = vld [vmem:[%s1356_s12 + $0x50] sm:$0xff]  }
  0x6d   : > { %750 = vmatpush.xpose.msk.msra.mxu2 %vm1375_vm1, %v401_v22  ;;  %v826_v41 = vunpack.c.1.s8 %v888_v17  ;;  %v397_v43 = vcvt.s32.f32 %v873_v34  ;;  %v869_v44 = vunpack.c.2.s8 %v895_v36  ;;  %v821_v46 = vunpack.c.2.s8 %v887_v42 }
  0x6e   : > { %718 = vmatpush.xpose.msk.msra.mxu0 %vm1375_vm1, %v369_v30  ;;  %v365_v45 = vcvt.s32.f32 %v825_v37  ;;  %v398_v47 = vcvt.s32.f32 %v874_v39  ;;  %v870_v48 = vunpack.c.3.s8 %v895_v36  ;;  %v822_v50 = vunpack.c.3.s8 %v887_v42 }
  0x6f   : > { %766 = vmatpush.xpose.msk.msra.mxu3 %vm1381_vm2, %v402_v28  ;;  %734 = vmatpush.xpose.msk.msra.mxu1 %vm1381_vm2, %v370_v31  ;;  %v366_v49 = vcvt.s32.f32 %v826_v41  ;;  %v395_v51 = vcvt.s32.f32 %v869_v44  ;;  %v867_v52 = vunpack.c.0.s8 %v895_v36  ;;  %v363_v53 = vcvt.s32.f32 %v821_v46 }
  0x70   : > { %v819_v55 = vunpack.c.0.s8 %v887_v42  ;;  %v396_v56 = vcvt.s32.f32 %v870_v48  ;;  %v868_v57 = vunpack.c.1.s8 %v895_v36  ;;  %v364_v58 = vcvt.s32.f32 %v822_v50 }
  0x71   : > { %751 = vmatpush.xpose.msk.msra.mxu2 %vm1375_vm1, %v399_v33  ;;  %v820_v59 = vunpack.c.1.s8 %v887_v42  ;;  %v393_v61 = vcvt.s32.f32 %v867_v52  ;;  %v863_v62 = vunpack.c.2.s8 %v894_v54  ;;  %v815_v0 = vunpack.c.2.s8 %v886_v60 }
  0x72   : > { %719 = vmatpush.xpose.msk.msra.mxu0 %vm1375_vm1, %v367_v35  ;;  %v361_v63 = vcvt.s32.f32 %v819_v55  ;;  %v394_v1 = vcvt.s32.f32 %v868_v57  ;;  %v864_v2 = vunpack.c.3.s8 %v894_v54  ;;  %v816_v5 = vunpack.c.3.s8 %v886_v60  ;;  %v884_v35 = vld [vmem:[%s1356_s12 + $0x10] sm:$0xff]  }
  0x73   : > { %767 = vmatpush.xpose.msk.msra.mxu3 %vm1381_vm2, %v400_v38  ;;  %735 = vmatpush.xpose.msk.msra.mxu1 %vm1381_vm2, %v368_v40  ;;  %v362_v3 = vcvt.s32.f32 %v820_v59  ;;  %v391_v6 = vcvt.s32.f32 %v863_v62  ;;  %v861_v7 = vunpack.c.0.s8 %v894_v54  ;;  %v359_v8 = vcvt.s32.f32 %v815_v0 }
  0x74   : > { %v813_v10 = vunpack.c.0.s8 %v886_v60  ;;  %v392_v11 = vcvt.s32.f32 %v864_v2  ;;  %v862_v12 = vunpack.c.1.s8 %v894_v54  ;;  %v360_v13 = vcvt.s32.f32 %v816_v5 }
  0x75   : > { %752 = vmatpush.xpose.msk.msra.mxu2 %vm1375_vm1, %v397_v43  ;;  %v814_v14 = vunpack.c.1.s8 %v886_v60  ;;  %v389_v16 = vcvt.s32.f32 %v861_v7  ;;  %v857_v17 = vunpack.c.2.s8 %v893_v9  ;;  %v809_v20 = vunpack.c.2.s8 %v885_v15 }
  0x76   : > { %720 = vmatpush.xpose.msk.msra.mxu0 %vm1375_vm1, %v365_v45  ;;  %v357_v19 = vcvt.s32.f32 %v813_v10  ;;  %v390_v21 = vcvt.s32.f32 %v862_v12  ;;  %v858_v22 = vunpack.c.3.s8 %v893_v9  ;;  %v810_v24 = vunpack.c.3.s8 %v885_v15 }
  0x77   : > { %768 = vmatpush.xpose.msk.msra.mxu3 %vm1381_vm2, %v398_v47  ;;  %736 = vmatpush.xpose.msk.msra.mxu1 %vm1381_vm2, %v366_v49  ;;  %v358_v23 = vcvt.s32.f32 %v814_v14  ;;  %v387_v25 = vcvt.s32.f32 %v857_v17  ;;  %v855_v27 = vunpack.c.0.s8 %v893_v9  ;;  %v355_v28 = vcvt.s32.f32 %v809_v20  ;;  %v891_v47 = vld [vmem:[%s1356_s12 + $0x48] sm:$0xff]  }
  0x78   : > { %v807_v30 = vunpack.c.0.s8 %v885_v15  ;;  %v388_v31 = vcvt.s32.f32 %v858_v22  ;;  %v856_v32 = vunpack.c.1.s8 %v893_v9  ;;  %v356_v33 = vcvt.s32.f32 %v810_v24 }
  0x79   : > { %753 = vmatpush.xpose.msk.msra.mxu2 %vm1375_vm1, %v395_v51  ;;  %v808_v34 = vunpack.c.1.s8 %v885_v15  ;;  %v385_v36 = vcvt.s32.f32 %v855_v27  ;;  %v851_v37 = vunpack.c.2.s8 %v892_v29  ;;  %v803_v39 = vunpack.c.2.s8 %v884_v35 }
  0x7a   : > { %721 = vmatpush.xpose.msk.msra.mxu0 %vm1375_vm1, %v363_v53  ;;  %v353_v38 = vcvt.s32.f32 %v807_v30  ;;  %v386_v40 = vcvt.s32.f32 %v856_v32  ;;  %v852_v41 = vunpack.c.3.s8 %v892_v29  ;;  %v804_v43 = vunpack.c.3.s8 %v884_v35  ;;  %v883_v53 = vld [vmem:[%s1356_s12 + $0x8] sm:$0xff]  }
  0x7b   : > { %769 = vmatpush.xpose.msk.msra.mxu3 %vm1381_vm2, %v396_v56  ;;  %737 = vmatpush.xpose.msk.msra.mxu1 %vm1381_vm2, %v364_v58  ;;  %v354_v42 = vcvt.s32.f32 %v808_v34  ;;  %v383_v44 = vcvt.s32.f32 %v851_v37  ;;  %v849_v45 = vunpack.c.0.s8 %v892_v29  ;;  %v351_v46 = vcvt.s32.f32 %v803_v39 }
  0x7c   : > { %v801_v48 = vunpack.c.0.s8 %v884_v35  ;;  %v384_v49 = vcvt.s32.f32 %v852_v41  ;;  %v850_v50 = vunpack.c.1.s8 %v892_v29  ;;  %v352_v51 = vcvt.s32.f32 %v804_v43 }
  0x7d   : > { %754 = vmatpush.xpose.msk.msra.mxu2 %vm1375_vm1, %v393_v61  ;;  %v802_v52 = vunpack.c.1.s8 %v884_v35  ;;  %v381_v54 = vcvt.s32.f32 %v849_v45  ;;  %v845_v55 = vunpack.c.2.s8 %v891_v47  ;;  %v797_v57 = vunpack.c.2.s8 %v883_v53 }
  0x7e   : > { %722 = vmatpush.xpose.msk.msra.mxu0 %vm1375_vm1, %v361_v63  ;;  %v349_v56 = vcvt.s32.f32 %v801_v48  ;;  %v382_v58 = vcvt.s32.f32 %v850_v50  ;;  %v846_v59 = vunpack.c.3.s8 %v891_v47  ;;  %v798_v61 = vunpack.c.3.s8 %v883_v53 }
  0x7f   : > { %770 = vmatpush.xpose.msk.msra.mxu3 %vm1381_vm2, %v394_v1  ;;  %738 = vmatpush.xpose.msk.msra.mxu1 %vm1381_vm2, %v362_v3  ;;  %v350_v60 = vcvt.s32.f32 %v802_v52  ;;  %v379_v62 = vcvt.s32.f32 %v845_v55  ;;  %v843_v63 = vunpack.c.0.s8 %v891_v47  ;;  %v347_v0 = vcvt.s32.f32 %v797_v57  ;;  %v890_v1 = vld [vmem:[%s1356_s12 + $0x40] sm:$0xff]  }
  0x80   : > { %v795_v2 = vunpack.c.0.s8 %v883_v53  ;;  %v380_v3 = vcvt.s32.f32 %v846_v59  ;;  %v844_v5 = vunpack.c.1.s8 %v891_v47  ;;  %v796_v7 = vunpack.c.1.s8 %v883_v53 }
  0x81   : > { %755 = vmatpush.xpose.msk.msra.mxu2 %vm1375_vm1, %v391_v6  ;;  %v348_v6 = vcvt.s32.f32 %v798_v61  ;;  %v377_v9 = vcvt.s32.f32 %v843_v63  ;;  %v839_v10 = vunpack.c.2.s8 %v890_v1  ;;  %v840_v14 = vunpack.c.3.s8 %v890_v1 }
  0x82   : > { %723 = vmatpush.xpose.msk.msra.mxu0 %vm1375_vm1, %v359_v8  ;;  %v788_v8 = vld [vmem:[%s1356_s12] sm:$0xff]   ;;  %v346_v15 = vcvt.s32.f32 %v796_v7  ;;  %vm575_vm4 = vcmp.lt.s32.totalorder %v405_v4, 256 }
  0x83   : > { %771 = vmatpush.xpose.msk.msra.mxu3 %vm1381_vm2, %v392_v11  ;;  %739 = vmatpush.xpose.msk.msra.mxu1 %vm1381_vm2, %v360_v13  ;;  %v345_v11 = vcvt.s32.f32 %v795_v2  ;;  %v791_v12 = vunpack.c.2.s8 %v788_v8  ;;  %v378_v13 = vcvt.s32.f32 %v844_v5  ;;  %v375_v17 = vcvt.s32.f32 %v839_v10 }
  0x84   : > { %v376_v22 = vcvt.s32.f32 %v840_v14 }
  0x85   : > { %756 = vmatpush.xpose.msk.msra.mxu2 %vm1375_vm1, %v389_v16  ;;  %v792_v16 = vunpack.c.3.s8 %v788_v8  ;;  %v343_v20 = vcvt.s32.f32 %v791_v12 }
  0x86   : > { %724 = vmatpush.xpose.msk.msra.mxu0 %vm1375_vm1, %v357_v19  ;;  %v837_v19 = vunpack.c.0.s8 %v890_v1 }
  0x87   : > { %772 = vmatpush.xpose.msk.msra.mxu3 %vm1381_vm2, %v390_v21  ;;  %740 = vmatpush.xpose.msk.msra.mxu1 %vm1381_vm2, %v358_v23  ;;  %v789_v21 = vunpack.c.0.s8 %v788_v8  ;;  %v838_v23 = vunpack.c.1.s8 %v890_v1  ;;  %v344_v24 = vcvt.s32.f32 %v792_v16 }
  0x88   : > { %v373_v27 = vcvt.s32.f32 %v837_v19 }
  0x89   : > { %757 = vmatpush.xpose.msk.msra.mxu2 %vm1375_vm1, %v387_v25  ;;  %v790_v25 = vunpack.c.1.s8 %v788_v8  ;;  %v341_v29 = vcvt.s32.f32 %v789_v21  ;;  %v374_v30 = vcvt.s32.f32 %v838_v23 }
  0x8a   : > { %725 = vmatpush.xpose.msk.msra.mxu0 %vm1375_vm1, %v355_v28  ;;  %v479_v28 = vld [vmem:[%s478_s17] sm:$0x3] }
  0x8b   : > { %773 = vmatpush.xpose.msk.msra.mxu3 %vm1381_vm2, %v388_v31  ;;  %741 = vmatpush.xpose.msk.msra.mxu1 %vm1381_vm2, %v356_v33  ;;  %v342_v31 = vcvt.s32.f32 %v790_v25  ;;  %v482_v32 = vperm.slane %v479_v28, 0  ;;  %v483_v33 = vperm.slane %v479_v28, 1 }
  0x8d   : > { %758 = vmatpush.xpose.msk.msra.mxu2 %vm1375_vm1, %v385_v36 }
  0x8e   : > { %726 = vmatpush.xpose.msk.msra.mxu0 %vm1375_vm1, %v353_v38 }
  0x8f   : > { %774 = vmatpush.xpose.msk.msra.mxu3 %vm1381_vm2, %v386_v40  ;;  %742 = vmatpush.xpose.msk.msra.mxu1 %vm1381_vm2, %v354_v42 }
  0x91   : > { %759 = vmatpush.xpose.msk.msra.mxu2 %vm1375_vm1, %v383_v44 }
  0x92   : > { %727 = vmatpush.xpose.msk.msra.mxu0 %vm1375_vm1, %v351_v46 }
  0x93   : > { %775 = vmatpush.xpose.msk.msra.mxu3 %vm1381_vm2, %v384_v49  ;;  %743 = vmatpush.xpose.msk.msra.mxu1 %vm1381_vm2, %v352_v51 }
  0x95   : > { %760 = vmatpush.xpose.msk.msra.mxu2 %vm1375_vm1, %v381_v54 }
  0x96   : > { %728 = vmatpush.xpose.msk.msra.mxu0 %vm1375_vm1, %v349_v56 }
  0x97   : > { %776 = vmatpush.xpose.msk.msra.mxu3 %vm1381_vm2, %v382_v58  ;;  %744 = vmatpush.xpose.msk.msra.mxu1 %vm1381_vm2, %v350_v60 }
  0x99   : > { %761 = vmatpush.xpose.msk.msra.mxu2 %vm1375_vm1, %v379_v62 }
  0x9a   : > { %729 = vmatpush.xpose.msk.msra.mxu0 %vm1375_vm1, %v347_v0 }
  0x9b   : > { %777 = vmatpush.xpose.msk.msra.mxu3 %vm1381_vm2, %v380_v3  ;;  %745 = vmatpush.xpose.msk.msra.mxu1 %vm1381_vm2, %v348_v6 }
  0x9d   : > { %762 = vmatpush.xpose.msk.msra.mxu2 %vm1375_vm1, %v377_v9 }
  0x9e   : > { %730 = vmatpush.xpose.msk.msra.mxu0 %vm1375_vm1, %v345_v11 }
  0x9f   : > { %778 = vmatpush.xpose.msk.msra.mxu3 %vm1381_vm2, %v378_v13  ;;  %746 = vmatpush.xpose.msk.msra.mxu1 %vm1381_vm2, %v346_v15 }
  0xa1   : > { %763 = vmatpush.xpose.msk.msra.mxu2 %vm1375_vm1, %v375_v17 }
  0xa2   : > { %731 = vmatpush.xpose.msk.msra.mxu0 %vm1375_vm1, %v343_v20 }
  0xa3   : > { %779 = vmatpush.xpose.msk.msra.mxu3 %vm1381_vm2, %v376_v22  ;;  %747 = vmatpush.xpose.msk.msra.mxu1 %vm1381_vm2, %v344_v24 }
  0xa5   : > { %764 = vmatpush.xpose.msk.msra.mxu2 %vm1375_vm1, %v373_v27 }
  0xa6   : > { %732 = vmatpush.xpose.msk.msra.mxu0 %vm1375_vm1, %v341_v29 }
  0xa7   : > { %780 = vmatpush.xpose.msk.msra.mxu3 %vm1381_vm2, %v374_v30  ;;  %748 = vmatpush.xpose.msk.msra.mxu1 %vm1381_vm2, %v342_v31 }
  0xa8   : > { %542 = vmatmul.f32.vlgmr.msra.gmra.mxu2 %v482_v32 }
  0xa9   : > { %502 = vmatmul.f32.vlgmr.msra.gmra.mxu0 %v482_v32 }
  0xaa   : > { %562 = vmatmul.f32.vlgmr.msra.gmra.mxu3 %v483_v33  ;;  %522 = vmatmul.f32.vlgmr.msra.gmra.mxu1 %v483_v33 }
 0x126   : > { %v503_v34 = vpop.f32.mrf.mxu0 }
 0x127   : > { %v523_v36 = vpop.f32.mrf.mxu1 }
 0x128   : > { %v524_v39 = vadd.f32 %v523_v36, %v503_v34 }
 0x12b   : > { %v543_v35 = vpop.f32.mrf.mxu2 }
 0x12d   : > { %v563_v37 = vpop.f32.mrf.mxu3 }
 0x12e   : > { %v564_v38 = vadd.f32 %v563_v37, %v543_v35 }
 0x130   : > { %v568_v40 = vrot.slane %v564_v38, 7 }
 0x131   : > { %581 = sbr.rel (%p781_p7) target bundleno = 432 (0x1b0), region = 44 }
 0x132   : > { %v570_v41 = vsel %vm569_vm3, %v524_v39, %v568_v40 }
 0x133   : > { %v572_v42 = vadd.f32 %v570_v41, %v480_v18 }
 0x135   : > { %577 = vst.msk [vmem:[#allocation2] sm:$0x3] %vm575_vm4, %v572_v42 }
 0x136   : > { %v583_v26 = vld [vmem:[#allocation3] sm:$0x1]  ;;  %v1177_v43 = vmov 0  }
 0x137   : > { %998 = vset.pattern.permute.xlu0 %v1177_v43 }
 0x138   : > { %586 = vperm.xlu0 %998, %v583_v26  }
 0x13c   : > { %v582_v45 = vld [vmem:[#allocation2] sm:$0x3] }
 0x1aa   : > { %v587_v44 = vpop.permute.xlu0 %586 }
 0x1ab   : > { %v589_v46 = vperm.slane %v587_v44, 0 }
 0x1ad   : > { %v590_v47 = vadd.f32 %v589_v46, %v582_v45 }
 0x1af   : > { %591 = vst.msk [vmem:[%s221_s9] sm:$0x3] %vm575_vm4, %v590_v47 }
 0x1b0 PF: > { %s1533_s30 = scalar_lea.sflag [#allocation6], %s219_s19  ;;  %599 = sbr.rel (!%p1284_p12) target bundleno = 466 (0x1d2), region = 48 }
 0x1b1   : > { %s783_s20 = sshll.u32 (%p1284_p12), %s1159_s2, 1 }
 0x1b2   : > { %s601_s6 = ssub.s32 (%p1284_p12), 3, %s783_s20 }
 0x1b3   : > { %p602_p10 = scmp.lt.s32.totalorder (%p1284_p12), %s601_s6, 2 }
 0x1b5   : > { %s1658_s6 = smov (!%p602_p10, %s601_s6), 2 }
 0x1b6   : > { %s604_s27 = ssub.s32 2, %s1658_s6 }
 0x1b7   : > { %s605_s26 = sshll.u32 %s604_s27, 4 }
 0x1b8   : > { %606 = vsyncadd %s1533_s30, %s605_s26  ;;  %p784_p11 = scmp.ne.s32.totalorder %s1658_s6, 0  ;;  %s608_s24 = scalar_lea.hbm %s1613_s3, %s783_s20 }
 0x1b9   : > { %s609_s28 = sshll.u32 %s1658_s6, 4  ;;  %s1549_s2 = sshll.u32 %s221_s9, 4  ;;  %s611_s2 = int_to_ptr.vmem [resolvable:$true] %s1549_s2 }
 0x1ba   : > { %s612_s25 = sshll.u32 %s608_s24, 4  ;;  %s1038_s12 = sshra.s32 %s611_s2, 4  ;;  %s613_s25 = int_to_ptr.hbm [resolvable:$true] %s612_s25  ;;  %s1039_s12 = int_to_ptr.vmem [resolvable:$true] %s1038_s12 }
 0x1bb   : > { %s1040_s19 = sshrl.u32 %s609_s28, 4  ;;  %s1178_s10 = smov [#allocation7]  }
 0x1bc   : > { %s1045_s5 = scalar_lea.vmem %s1039_s12, %s1040_s19  ;;  %s1049_s29 = scalar_lea.vmem %s1178_s10, 4 }
 0x1bd   : > { %p1046_p12 = scmp.ne.s32.totalorder %s1039_s12, %s1045_s5  ;;  %p1051_p2 = scmp.lt.s32.totalorder %s1049_s29, %s1045_s5 }
 0x1bf   : > { %p1047_p13 = pnand %p1046_p12, %p784_p11 }
 0x1c1   : > { %p1048_p0 = pneg %p1047_p13 }
 0x1c3   : > { %p1053_p4 = pnand %p1051_p2, %p1048_p0 }
 0x1c5   : > { %1056 = shalt.err (!%p1053_p4)
}
 0x1c6   : > { %s1057_s21 = sshra.s32 %s613_s25, 4  ;;  %s1068_s17 = scalar_lea.hbm %s1613_s3, 3  ;;  %s1058_s21 = int_to_ptr.hbm [resolvable:$true] %s1057_s21 }
 0x1c7   : > { %s1064_s9 = scalar_lea.hbm %s1058_s21, %s1040_s19  ;;  %p1069_p9 = scmp.lt.s32.totalorder %s1058_s21, %s1613_s3 }
 0x1c8   : > { %p1065_p5 = scmp.ne.s32.totalorder %s1058_s21, %s1064_s9  ;;  %p1070_p3 = scmp.lt.s32.totalorder %s1068_s17, %s1064_s9 }
 0x1ca   : > { %p1066_p6 = pnand %p1065_p5, %p784_p11  ;;  %p1071_p7 = por %p1070_p3, %p1069_p9 }
 0x1cc   : > { %p1067_p8 = pneg %p1066_p6 }
 0x1ce   : > { %p1072_p10 = pnand %p1071_p7, %p1067_p8 }
 0x1d0   : > { %1075 = shalt.err (!%p1072_p10)
}
 0x1d1   : > { %615 = dma.vmem_to_hbm [thread:$0]  (%p784_p11), %s611_s2, %s609_s28, %s613_s25, %s1533_s30  }
 0x1d2 PF: > { %p905_p12 = scmp.ge.s32.totalorder %s1171_s23, 2  ;;  %s624_s26 = sand.u32 1, %s1131_s14  }
 0x1d3   : > { %s625_s13 = scalar_lea.sflag [#allocation6], %s624_s26 }
 0x1d4   : > { %p902_p13 = pnand %p905_p12, %p1296_p1 }
 0x1d6   : > { %p903_p0 = pneg %p902_p13 }
 0x1d8   : > { %1126 = dma.done.wait (%p903_p0), %s625_s13, 32  }
 0x1d9   : > { %1128 = vsyncadd (%p903_p0), %s625_s13, 4294967264  ;;  %s21_s23 = sadd.s32 1, %s1171_s23   ;;  %s1634_s6 = sld [smem:[#allocation14_spill]] }
 0x1da   : > { %p18_p2 = scmp.ge.s32.totalorder %s21_s23, 8   ;;  %s1635_s30 = sld [smem:[#allocation10_spill]] }
 0x1db   : > { %s1636_s19 = sld [smem:[#allocation15_spill]]  ;;  %s1640_s14 = smov %s1135_s15 }
 0x1dc   : > { %s1637_s20 = sld [smem:[#allocation11_spill]]  ;;  %s1641_s15 = smov %s1139_s16 }
 0x1dd   : > { %s1638_s21 = sld [smem:[#allocation12_spill]]  ;;  %s1643_s17 = smov %s1147_s18 }
 0x1de   : > { %s1639_s8 = sld [smem:[#allocation13_spill]]  ;;  %s1645_s2 = smov %s1167_s22 }
 0x1df   : > { %s1642_s16 = smov %s1634_s6 }
 0x1e0   : > { %s1644_s18 = smov %s1635_s30  ;;  %20 = sbr.rel (!%p18_p2) target bundleno = 12 (0xc), region = 86 }
 0x1e4   : > { %s1646_s22 = smov %s1639_s8 }
 0x1e5   :  { %631 = vsyncpa [#allocation5], 1 }
 0x1e6   :  { %633 = vsyncpa [#allocation5 + $0x1], 1 }
 0x1e7   :  { %634 = vsyncpa [#allocation6], 1 }
 0x1e8   :  { %636 = vsyncpa [#allocation6 + $0x1], 1 }

</bundles_post_ra>
